<compile_context>
chip_gen: v5e
topology: v5e:2x2
jax: 0.10.0
libtpu: 0.0.40
codegen_flags: <defaults>
</compile_context>

<pallas_src>
import functools

import jax
import jax.numpy as jnp
from jax import lax
from jax.experimental import pallas as pl
from jax.experimental.pallas import tpu as pltpu

NEG_SLOPE = 0.2      # PyG GATConv default LeakyReLU slope
MASK_VAL = -1e30     # additive mask for non-edges


def _gat_head(xw_h, att_s, att_d, adj_bias):
    """One attention head on a dense, additively-masked adjacency.

    xw_h    : [N, C] f32  projected features for this head
    att_s   : [1, C] f32  source attention vector
    att_d   : [1, C] f32  destination attention vector
    adj_bias: [N, N] f32  0.0 where edge (src j -> dst i) exists (incl. self loops), -1e30 otherwise
    returns [N, C] f32
    """
    a_dst = jnp.sum(xw_h * att_d, axis=-1, keepdims=True)                         # [N, 1]
    # contract last dims of both operands -> no explicit transpose of the [N, C] tile
    a_src = lax.dot_general(att_s, xw_h, (((1,), (1,)), ((), ())),
                            preferred_element_type=jnp.float32)                   # [1, N]
    e = a_dst + a_src                                                             # e[i, j] = a_dst[i] + a_src[j]
    e = jnp.maximum(e, NEG_SLOPE * e)                                             # LeakyReLU(0.2)
    e = e + adj_bias                                                              # single masking pass
    e = e - jnp.max(e, axis=-1, keepdims=True)                                    # stable softmax (>=1 edge per row)
    p = jnp.exp(e)                                                                # masked entries underflow to 0
    denom = jnp.sum(p, axis=-1, keepdims=True)                                    # [N, 1]
    num = jnp.dot(p.astype(jnp.bfloat16), xw_h.astype(jnp.bfloat16),
                  preferred_element_type=jnp.float32)                             # [N, C]
    return num * pl.reciprocal(denom, approx=True)                                # deferred normalization (EUP)


def movie_gat_kernel(x_ref, adjb_ref, w1_ref, as1_ref, ad1_ref, b1_ref,
                     w2_ref, as2_ref, ad2_ref, b2_ref, out_ref, *, heads):
    x = x_ref[...]            # [N, hidden] bf16
    adj_bias = adjb_ref[...]  # [N, N] f32

    # ---- GAT layer 1 (per head) -> ELU -> per-head projection into the layer-2 input ----
    xw2 = None
    for h in range(heads):    # static unroll; per-head weights indexed on the leading (free) axis
        xw_h = jnp.dot(x, w1_ref[h], preferred_element_type=jnp.float32)           # [N, hidden] f32
        o_h = _gat_head(xw_h, as1_ref[h:h + 1, :], ad1_ref[h:h + 1, :], adj_bias)  # [N, hidden]
        o_h = o_h + b1_ref[h:h + 1, :]
        o_h = jnp.where(o_h > 0, o_h, jnp.exp(o_h) - 1.0)                          # ELU
        part = jnp.dot(o_h.astype(jnp.bfloat16), w2_ref[h],
                       preferred_element_type=jnp.float32)                         # [N, out_dim]
        xw2 = part if xw2 is None else xw2 + part                                  # == concat(heads) @ W2

    # TODO(synk): attention dropout (p=0.1) is training-only in GATConv; eval semantics used here.

    # ---- GAT layer 2: heads*hidden -> out_dim, 1 head, concat=False ----
    o = _gat_head(xw2, as2_ref[...], ad2_ref[...], adj_bias)                       # [N, out_dim]
    out_ref[...] = o + b2_ref[...]


def movie_gat_forward(x, adj, params, *, heads, hidden, out_dim):
    N = x.shape[0]
    # Additive attention mask built once outside the kernel (0 on edges, -1e30 elsewhere).
    adj_bias = jnp.where(adj > 0, 0.0, MASK_VAL).astype(jnp.float32)

    # Split weights per head so the kernel indexes a leading axis (free) instead of 32-lane column slices,
    # and cast MXU operands to bf16 (f32 accumulation is kept inside the kernel).
    w1_h = params["w1"].reshape(hidden, heads, hidden).transpose(1, 0, 2).astype(jnp.bfloat16)  # [H, hidden, hidden]
    w2_h = params["w2"].reshape(heads, hidden, out_dim).astype(jnp.bfloat16)                    # [H, hidden, out_dim]
    b1_h = params["b1"].reshape(heads, hidden)                                                  # [H, hidden]

    kernel = functools.partial(movie_gat_kernel, heads=heads)
    vmem = pl.BlockSpec(memory_space=pltpu.MemorySpace.VMEM)
    # TODO(synk): for large N, tile destination rows / stream source tiles flash-attention-style instead of
    #             whole-in-VMEM; at these sizes a single invocation is both simplest and fastest.
    return pl.pallas_call(
        kernel,
        out_shape=jax.ShapeDtypeStruct((N, out_dim), jnp.float32),
        in_specs=[vmem] * 10,
        out_specs=vmem,
        compiler_params=pltpu.CompilerParams(vmem_limit_bytes=64 * 1024 * 1024),
    )(x.astype(jnp.bfloat16), adj_bias,
      w1_h, params["as1"], params["ad1"], b1_h,
      w2_h, params["as2"], params["ad2"], params["b2"])


def build_adjacency(edge_index, num_nodes):
    """Dense mask from COO edge list; adj[dst, src] = 1, plus self-loops (PyG add_self_loops=True)."""
    adj = jnp.zeros((num_nodes, num_nodes), jnp.float32)
    adj = adj.at[edge_index[1], edge_index[0]].set(1.0)
    idx = jnp.arange(num_nodes)
    adj = adj.at[idx, idx].set(1.0)
    return adj


if __name__ == "__main__":
    # Small synthetic shapes consistent with the module
    num_users, num_movies = 16, 16
    N = num_users + num_movies
    hidden_dim, out_dim, heads = 32, 16, 2
    num_edges = 48

    key = jax.random.PRNGKey(0)
    ks = jax.random.split(key, 12)

    # Embedding tables (nn.Embedding weights) — deterministic init
    user_emb = 0.1 * jax.random.normal(ks[0], (num_users, hidden_dim), jnp.float32)
    movie_emb = 0.1 * jax.random.normal(ks[1], (num_movies, hidden_dim), jnp.float32)
    x = jnp.concatenate([user_emb, movie_emb], axis=0)                             # [N, hidden]

    # GATConv parameters
    params = {
        # gat1: in=hidden, out=hidden, heads=2, concat=True
        "w1": 0.1 * jax.random.normal(ks[2], (hidden_dim, heads * hidden_dim), jnp.float32),
        "as1": 0.1 * jax.random.normal(ks[3], (heads, hidden_dim), jnp.float32),
        "ad1": 0.1 * jax.random.normal(ks[4], (heads, hidden_dim), jnp.float32),
        "b1": jnp.zeros((1, heads * hidden_dim), jnp.float32),
        # gat2: in=heads*hidden, out=out_dim, heads=1, concat=False
        "w2": 0.1 * jax.random.normal(ks[5], (heads * hidden_dim, out_dim), jnp.float32),
        "as2": 0.1 * jax.random.normal(ks[6], (1, out_dim), jnp.float32),
        "ad2": 0.1 * jax.random.normal(ks[7], (1, out_dim), jnp.float32),
        "b2": jnp.zeros((1, out_dim), jnp.float32),
    }

    # Synthetic bipartite edges: user -> movie (movie ids offset by num_users)
    users = jax.random.randint(ks[8], (num_edges,), 0, num_users)
    movies = jax.random.randint(ks[9], (num_edges,), 0, num_movies) + num_users
    edge_index = jnp.stack([users, movies]).astype(jnp.int32)                      # [2, E]

    adj = build_adjacency(edge_index, N)                                           # [N, N]

    out = movie_gat_forward(x, adj, params, heads=heads, hidden=hidden_dim, out_dim=out_dim)
    out = jax.block_until_ready(out)
    assert out.shape == (N, out_dim) and jnp.all(jnp.isfinite(out))
    print("KERNEL_OK")
</pallas_src>

<mosaic_0001>
module attributes {stable_mosaic.version = 11 : i64} {
  func.func @movie_gat_kernel(%arg0: memref<32x32xbf16, #tpu.memory_space<vmem>>, %arg1: memref<32x32xf32, #tpu.memory_space<vmem>>, %arg2: memref<2x32x32xbf16, #tpu.memory_space<vmem>>, %arg3: memref<2x32xf32, #tpu.memory_space<vmem>>, %arg4: memref<2x32xf32, #tpu.memory_space<vmem>>, %arg5: memref<2x32xf32, #tpu.memory_space<vmem>>, %arg6: memref<2x32x16xbf16, #tpu.memory_space<vmem>>, %arg7: memref<1x16xf32, #tpu.memory_space<vmem>>, %arg8: memref<1x16xf32, #tpu.memory_space<vmem>>, %arg9: memref<1x16xf32, #tpu.memory_space<vmem>>, %arg10: memref<32x16xf32, #tpu.memory_space<vmem>>) attributes {dimension_semantics = [], scalar_prefetch = 0 : i64, scratch_operands = 0 : i64, tpu.core_type = #tpu.core_type<tc>} {
    %c0 = arith.constant 0 : index
    %c0_0 = arith.constant 0 : index
    %0 = vector.load %arg0[%c0, %c0_0] : memref<32x32xbf16, #tpu.memory_space<vmem>>, vector<32x32xbf16>
    %c0_1 = arith.constant 0 : index
    %c0_2 = arith.constant 0 : index
    %1 = vector.load %arg1[%c0_1, %c0_2] : memref<32x32xf32, #tpu.memory_space<vmem>>, vector<32x32xf32>
    %c0_3 = arith.constant 0 : index
    %c0_4 = arith.constant 0 : index
    %c0_5 = arith.constant 0 : index
    %2 = vector.load %arg2[%c0_3, %c0_4, %c0_5] : memref<2x32x32xbf16, #tpu.memory_space<vmem>>, vector<1x32x32xbf16>
    %3 = vector.shape_cast %2 : vector<1x32x32xbf16> to vector<32x32xbf16>
    %cst = arith.constant dense<0.000000e+00> : vector<32x32xf32>
    %4 = tpu.matmul %0, %3, %cst {dimension_numbers = #tpu.dot_dimension_numbers<[1], [0], [0], [1], [0, 0, 1, 1], [], []>} : vector<32x32xbf16>, vector<32x32xbf16>, vector<32x32xf32> -> vector<32x32xf32>
    %c0_6 = arith.constant 0 : index
    %c0_7 = arith.constant 0 : index
    %5 = vector.load %arg3[%c0_6, %c0_7] : memref<2x32xf32, #tpu.memory_space<vmem>>, vector<1x32xf32>
    %c0_8 = arith.constant 0 : index
    %c0_9 = arith.constant 0 : index
    %6 = vector.load %arg4[%c0_8, %c0_9] : memref<2x32xf32, #tpu.memory_space<vmem>>, vector<1x32xf32>
    %7 = vector.broadcast %6 : vector<1x32xf32> to vector<32x32xf32>
    %8 = arith.mulf %4, %7 : vector<32x32xf32>
    %cst_10 = arith.constant dense<0.000000e+00> : vector<32xf32>
    %9 = vector.multi_reduction <add>, %8, %cst_10 [1] : vector<32x32xf32> to vector<32xf32>
    %10 = vector.shape_cast %9 : vector<32xf32> to vector<32x1xf32>
    %cst_11 = arith.constant dense<0.000000e+00> : vector<1x32xf32>
    %11 = tpu.matmul %5, %4, %cst_11 {dimension_numbers = #tpu.dot_dimension_numbers<[1], [1], [0], [0], [0, 0, 1, 0], [], []>} : vector<1x32xf32>, vector<32x32xf32>, vector<1x32xf32> -> vector<1x32xf32>
    %12 = vector.broadcast %10 : vector<32x1xf32> to vector<32x32xf32>
    %13 = vector.broadcast %11 : vector<1x32xf32> to vector<32x32xf32>
    %14 = arith.addf %12, %13 : vector<32x32xf32>
    %cst_12 = arith.constant 2.000000e-01 : f32
    %15 = vector.broadcast %cst_12 : f32 to vector<32x32xf32>
    %16 = arith.mulf %15, %14 : vector<32x32xf32>
    %17 = arith.maximumf %14, %16 : vector<32x32xf32>
    %18 = arith.addf %17, %1 : vector<32x32xf32>
    %cst_13 = arith.constant dense<0xFF800000> : vector<32xf32>
    %19 = vector.multi_reduction <maximumf>, %18, %cst_13 [1] : vector<32x32xf32> to vector<32xf32>
    %20 = vector.shape_cast %19 : vector<32xf32> to vector<32x1xf32>
    %21 = vector.broadcast %20 : vector<32x1xf32> to vector<32x32xf32>
    %22 = arith.subf %18, %21 : vector<32x32xf32>
    %23 = math.exp %22 : vector<32x32xf32>
    %cst_14 = arith.constant dense<0.000000e+00> : vector<32xf32>
    %24 = vector.multi_reduction <add>, %23, %cst_14 [1] : vector<32x32xf32> to vector<32xf32>
    %25 = vector.shape_cast %24 : vector<32xf32> to vector<32x1xf32>
    %26 = arith.truncf %23 : vector<32x32xf32> to vector<32x32xbf16>
    %27 = arith.truncf %4 : vector<32x32xf32> to vector<32x32xbf16>
    %cst_15 = arith.constant dense<0.000000e+00> : vector<32x32xf32>
    %28 = tpu.matmul %26, %27, %cst_15 {dimension_numbers = #tpu.dot_dimension_numbers<[1], [0], [0], [1], [0, 0, 1, 1], [], []>} : vector<32x32xbf16>, vector<32x32xbf16>, vector<32x32xf32> -> vector<32x32xf32>
    %29 = tpu.reciprocal %25 {approx = true} : vector<32x1xf32> -> vector<32x1xf32>
    %30 = vector.broadcast %29 : vector<32x1xf32> to vector<32x32xf32>
    %31 = arith.mulf %28, %30 : vector<32x32xf32>
    %c0_16 = arith.constant 0 : index
    %c0_17 = arith.constant 0 : index
    %32 = vector.load %arg5[%c0_16, %c0_17] : memref<2x32xf32, #tpu.memory_space<vmem>>, vector<1x32xf32>
    %33 = vector.broadcast %32 : vector<1x32xf32> to vector<32x32xf32>
    %34 = arith.addf %31, %33 : vector<32x32xf32>
    %cst_18 = arith.constant 0.000000e+00 : f32
    %35 = vector.broadcast %cst_18 : f32 to vector<32x32xf32>
    %36 = arith.cmpf ogt, %34, %35 : vector<32x32xf32>
    %37 = math.exp %34 : vector<32x32xf32>
    %cst_19 = arith.constant 1.000000e+00 : f32
    %38 = vector.broadcast %cst_19 : f32 to vector<32x32xf32>
    %39 = arith.subf %37, %38 : vector<32x32xf32>
    %40 = arith.select %36, %34, %39 : vector<32x32xi1>, vector<32x32xf32>
    %41 = arith.truncf %40 : vector<32x32xf32> to vector<32x32xbf16>
    %c0_20 = arith.constant 0 : index
    %c0_21 = arith.constant 0 : index
    %c0_22 = arith.constant 0 : index
    %42 = vector.load %arg6[%c0_20, %c0_21, %c0_22] : memref<2x32x16xbf16, #tpu.memory_space<vmem>>, vector<1x32x16xbf16>
    %43 = vector.shape_cast %42 : vector<1x32x16xbf16> to vector<32x16xbf16>
    %cst_23 = arith.constant dense<0.000000e+00> : vector<32x16xf32>
    %44 = tpu.matmul %41, %43, %cst_23 {dimension_numbers = #tpu.dot_dimension_numbers<[1], [0], [0], [1], [0, 0, 1, 1], [], []>} : vector<32x32xbf16>, vector<32x16xbf16>, vector<32x16xf32> -> vector<32x16xf32>
    %c1 = arith.constant 1 : index
    %c0_24 = arith.constant 0 : index
    %c0_25 = arith.constant 0 : index
    %45 = vector.load %arg2[%c1, %c0_24, %c0_25] : memref<2x32x32xbf16, #tpu.memory_space<vmem>>, vector<1x32x32xbf16>
    %46 = vector.shape_cast %45 : vector<1x32x32xbf16> to vector<32x32xbf16>
    %cst_26 = arith.constant dense<0.000000e+00> : vector<32x32xf32>
    %47 = tpu.matmul %0, %46, %cst_26 {dimension_numbers = #tpu.dot_dimension_numbers<[1], [0], [0], [1], [0, 0, 1, 1], [], []>} : vector<32x32xbf16>, vector<32x32xbf16>, vector<32x32xf32> -> vector<32x32xf32>
    %c1_27 = arith.constant 1 : index
    %c0_28 = arith.constant 0 : index
    %48 = vector.load %arg3[%c1_27, %c0_28] : memref<2x32xf32, #tpu.memory_space<vmem>>, vector<1x32xf32>
    %c1_29 = arith.constant 1 : index
    %c0_30 = arith.constant 0 : index
    %49 = vector.load %arg4[%c1_29, %c0_30] : memref<2x32xf32, #tpu.memory_space<vmem>>, vector<1x32xf32>
    %50 = vector.broadcast %49 : vector<1x32xf32> to vector<32x32xf32>
    %51 = arith.mulf %47, %50 : vector<32x32xf32>
    %cst_31 = arith.constant dense<0.000000e+00> : vector<32xf32>
    %52 = vector.multi_reduction <add>, %51, %cst_31 [1] : vector<32x32xf32> to vector<32xf32>
    %53 = vector.shape_cast %52 : vector<32xf32> to vector<32x1xf32>
    %cst_32 = arith.constant dense<0.000000e+00> : vector<1x32xf32>
    %54 = tpu.matmul %48, %47, %cst_32 {dimension_numbers = #tpu.dot_dimension_numbers<[1], [1], [0], [0], [0, 0, 1, 0], [], []>} : vector<1x32xf32>, vector<32x32xf32>, vector<1x32xf32> -> vector<1x32xf32>
    %55 = vector.broadcast %53 : vector<32x1xf32> to vector<32x32xf32>
    %56 = vector.broadcast %54 : vector<1x32xf32> to vector<32x32xf32>
    %57 = arith.addf %55, %56 : vector<32x32xf32>
    %cst_33 = arith.constant 2.000000e-01 : f32
    %58 = vector.broadcast %cst_33 : f32 to vector<32x32xf32>
    %59 = arith.mulf %58, %57 : vector<32x32xf32>
    %60 = arith.maximumf %57, %59 : vector<32x32xf32>
    %61 = arith.addf %60, %1 : vector<32x32xf32>
    %cst_34 = arith.constant dense<0xFF800000> : vector<32xf32>
    %62 = vector.multi_reduction <maximumf>, %61, %cst_34 [1] : vector<32x32xf32> to vector<32xf32>
    %63 = vector.shape_cast %62 : vector<32xf32> to vector<32x1xf32>
    %64 = vector.broadcast %63 : vector<32x1xf32> to vector<32x32xf32>
    %65 = arith.subf %61, %64 : vector<32x32xf32>
    %66 = math.exp %65 : vector<32x32xf32>
    %cst_35 = arith.constant dense<0.000000e+00> : vector<32xf32>
    %67 = vector.multi_reduction <add>, %66, %cst_35 [1] : vector<32x32xf32> to vector<32xf32>
    %68 = vector.shape_cast %67 : vector<32xf32> to vector<32x1xf32>
    %69 = arith.truncf %66 : vector<32x32xf32> to vector<32x32xbf16>
    %70 = arith.truncf %47 : vector<32x32xf32> to vector<32x32xbf16>
    %cst_36 = arith.constant dense<0.000000e+00> : vector<32x32xf32>
    %71 = tpu.matmul %69, %70, %cst_36 {dimension_numbers = #tpu.dot_dimension_numbers<[1], [0], [0], [1], [0, 0, 1, 1], [], []>} : vector<32x32xbf16>, vector<32x32xbf16>, vector<32x32xf32> -> vector<32x32xf32>
    %72 = tpu.reciprocal %68 {approx = true} : vector<32x1xf32> -> vector<32x1xf32>
    %73 = vector.broadcast %72 : vector<32x1xf32> to vector<32x32xf32>
    %74 = arith.mulf %71, %73 : vector<32x32xf32>
    %c1_37 = arith.constant 1 : index
    %c0_38 = arith.constant 0 : index
    %75 = vector.load %arg5[%c1_37, %c0_38] : memref<2x32xf32, #tpu.memory_space<vmem>>, vector<1x32xf32>
    %76 = vector.broadcast %75 : vector<1x32xf32> to vector<32x32xf32>
    %77 = arith.addf %74, %76 : vector<32x32xf32>
    %cst_39 = arith.constant 0.000000e+00 : f32
    %78 = vector.broadcast %cst_39 : f32 to vector<32x32xf32>
    %79 = arith.cmpf ogt, %77, %78 : vector<32x32xf32>
    %80 = math.exp %77 : vector<32x32xf32>
    %cst_40 = arith.constant 1.000000e+00 : f32
    %81 = vector.broadcast %cst_40 : f32 to vector<32x32xf32>
    %82 = arith.subf %80, %81 : vector<32x32xf32>
    %83 = arith.select %79, %77, %82 : vector<32x32xi1>, vector<32x32xf32>
    %84 = arith.truncf %83 : vector<32x32xf32> to vector<32x32xbf16>
    %c1_41 = arith.constant 1 : index
    %c0_42 = arith.constant 0 : index
    %c0_43 = arith.constant 0 : index
    %85 = vector.load %arg6[%c1_41, %c0_42, %c0_43] : memref<2x32x16xbf16, #tpu.memory_space<vmem>>, vector<1x32x16xbf16>
    %86 = vector.shape_cast %85 : vector<1x32x16xbf16> to vector<32x16xbf16>
    %cst_44 = arith.constant dense<0.000000e+00> : vector<32x16xf32>
    %87 = tpu.matmul %84, %86, %cst_44 {dimension_numbers = #tpu.dot_dimension_numbers<[1], [0], [0], [1], [0, 0, 1, 1], [], []>} : vector<32x32xbf16>, vector<32x16xbf16>, vector<32x16xf32> -> vector<32x16xf32>
    %88 = arith.addf %44, %87 : vector<32x16xf32>
    %c0_45 = arith.constant 0 : index
    %c0_46 = arith.constant 0 : index
    %89 = vector.load %arg7[%c0_45, %c0_46] : memref<1x16xf32, #tpu.memory_space<vmem>>, vector<1x16xf32>
    %c0_47 = arith.constant 0 : index
    %c0_48 = arith.constant 0 : index
    %90 = vector.load %arg8[%c0_47, %c0_48] : memref<1x16xf32, #tpu.memory_space<vmem>>, vector<1x16xf32>
    %91 = vector.broadcast %90 : vector<1x16xf32> to vector<32x16xf32>
    %92 = arith.mulf %88, %91 : vector<32x16xf32>
    %cst_49 = arith.constant dense<0.000000e+00> : vector<32xf32>
    %93 = vector.multi_reduction <add>, %92, %cst_49 [1] : vector<32x16xf32> to vector<32xf32>
    %94 = vector.shape_cast %93 : vector<32xf32> to vector<32x1xf32>
    %cst_50 = arith.constant dense<0.000000e+00> : vector<1x32xf32>
    %95 = tpu.matmul %89, %88, %cst_50 {dimension_numbers = #tpu.dot_dimension_numbers<[1], [1], [0], [0], [0, 0, 1, 0], [], []>} : vector<1x16xf32>, vector<32x16xf32>, vector<1x32xf32> -> vector<1x32xf32>
    %96 = vector.broadcast %94 : vector<32x1xf32> to vector<32x32xf32>
    %97 = vector.broadcast %95 : vector<1x32xf32> to vector<32x32xf32>
    %98 = arith.addf %96, %97 : vector<32x32xf32>
    %cst_51 = arith.constant 2.000000e-01 : f32
    %99 = vector.broadcast %cst_51 : f32 to vector<32x32xf32>
    %100 = arith.mulf %99, %98 : vector<32x32xf32>
    %101 = arith.maximumf %98, %100 : vector<32x32xf32>
    %102 = arith.addf %101, %1 : vector<32x32xf32>
    %cst_52 = arith.constant dense<0xFF800000> : vector<32xf32>
    %103 = vector.multi_reduction <maximumf>, %102, %cst_52 [1] : vector<32x32xf32> to vector<32xf32>
    %104 = vector.shape_cast %103 : vector<32xf32> to vector<32x1xf32>
    %105 = vector.broadcast %104 : vector<32x1xf32> to vector<32x32xf32>
    %106 = arith.subf %102, %105 : vector<32x32xf32>
    %107 = math.exp %106 : vector<32x32xf32>
    %cst_53 = arith.constant dense<0.000000e+00> : vector<32xf32>
    %108 = vector.multi_reduction <add>, %107, %cst_53 [1] : vector<32x32xf32> to vector<32xf32>
    %109 = vector.shape_cast %108 : vector<32xf32> to vector<32x1xf32>
    %110 = arith.truncf %107 : vector<32x32xf32> to vector<32x32xbf16>
    %111 = arith.truncf %88 : vector<32x16xf32> to vector<32x16xbf16>
    %cst_54 = arith.constant dense<0.000000e+00> : vector<32x16xf32>
    %112 = tpu.matmul %110, %111, %cst_54 {dimension_numbers = #tpu.dot_dimension_numbers<[1], [0], [0], [1], [0, 0, 1, 1], [], []>} : vector<32x32xbf16>, vector<32x16xbf16>, vector<32x16xf32> -> vector<32x16xf32>
    %113 = tpu.reciprocal %109 {approx = true} : vector<32x1xf32> -> vector<32x1xf32>
    %114 = vector.broadcast %113 : vector<32x1xf32> to vector<32x16xf32>
    %115 = arith.mulf %112, %114 : vector<32x16xf32>
    %c0_55 = arith.constant 0 : index
    %c0_56 = arith.constant 0 : index
    %116 = vector.load %arg9[%c0_55, %c0_56] : memref<1x16xf32, #tpu.memory_space<vmem>>, vector<1x16xf32>
    %117 = vector.broadcast %116 : vector<1x16xf32> to vector<32x16xf32>
    %118 = arith.addf %115, %117 : vector<32x16xf32>
    %c0_57 = arith.constant 0 : index
    %c0_58 = arith.constant 0 : index
    %119 = vector.load %arg10[%c0_57, %c0_58] : memref<32x16xf32, #tpu.memory_space<vmem>>, vector<32x16xf32>
    tpu.vector_store %arg10[%c0_57, %c0_58], %118 {strides = array<i32>} : memref<32x16xf32, #tpu.memory_space<vmem>>, vector<32x16xf32>,
    return
  }
}

</mosaic_0001>

<bundles_post_ra>
// kernel: tpu_custom_call.1
= control target key start
LH: loop header
LB: loop body
LE: loop exit
PB: predicated region body
PF: predicated region fallthrough
CT: control target
= control target key end

     0   :  { %15 = vsyncpa [#allocation3], 0  ;;  %s1200_s0 = inlined_call_operand.vmem [shape: bf16[32,32], index: 0, kind: input, shape index: {}]   ;;  %s1201_s1 = inlined_call_operand.vmem [shape: f32[32,32], index: 1, kind: input, shape index: {}]   ;;  %s1202_s2 = inlined_call_operand.hbm [shape: bf16[2,32,32], index: 2, kind: input, shape index: {}]   ;;  %s1203_s3 = inlined_call_operand.vmem [shape: f32[2,32], index: 3, kind: input, shape index: {}]   ;;  %s1204_s4 = inlined_call_operand.hbm [shape: f32[2,32], index: 4, kind: input, shape index: {}]   ;;  %s1205_s5 = inlined_call_operand.vmem [shape: f32[2,32], index: 5, kind: input, shape index: {}]   ;;  %s1206_s6 = inlined_call_operand.vmem [shape: bf16[2,32,16], index: 6, kind: input, shape index: {}]   ;;  %s1207_s7 = inlined_call_operand.vmem [shape: f32[1,16], index: 7, kind: input, shape index: {}]   ;;  %s1208_s8 = inlined_call_operand.vmem [shape: f32[1,16], index: 8, kind: input, shape index: {}]   ;;  %s1209_s9 = inlined_call_operand.vmem [shape: f32[1,16], index: 9, kind: input, shape index: {}]   ;;  %s1210_s10 = inlined_call_operand.vmem [shape: f32[32,16], index: 10, kind: output, shape index: {}]  }
   0x1   :  { %s25_s15 = sshll.u32 %s1202_s2, 4  ;;  %s26_s15 = int_to_ptr.hbm [resolvable:$true] %s25_s15 }
   0x2   :  { %16 = vsyncpa [#allocation5], 0  ;;  %s971_s16 = smov [#allocation2]   ;;  %s41_s20 = sshll.u32 %s1204_s4, 4  ;;  %s42_s20 = int_to_ptr.hbm [resolvable:$true] %s41_s20 }
   0x3   :  { %s27_s17 = sshll.u32 %s971_s16, 4  ;;  %s972_s21 = smov 64   ;;  %s28_s17 = int_to_ptr.vmem [resolvable:$true] %s27_s17 }
   0x4   :  { %s973_s22 = smov 4   ;;  %s974_s23 = smov [#allocation4]  }
   0x5   :  { %33 = dma.hbm_to_vmem [thread:$0]  %s26_s15, 512, %s28_s17, [#allocation3], %s972_s21, %s972_s21, %s973_s22  }
   0x6   :  { %s43_s24 = sshll.u32 %s974_s23, 4  ;;  %s44_s24 = int_to_ptr.vmem [resolvable:$true] %s43_s24 }
   0x7   :  { %46 = dma.hbm_to_vmem [thread:$0]  %s42_s20, 32, %s44_s24, [#allocation5]  }
   0x8   :  { %967 = dma.done.wait [#allocation3], 512  }
   0x9   :  { %968 = vsyncadd [#allocation3], 4294966784 }
   0xa   :  { %969 = dma.done.wait [#allocation5], 32  }
   0xb   :  { %970 = vsyncadd [#allocation5], 4294967264  ;;  %v838_v0 = vld [vmem:[#allocation2 + $0x8] sm:$0xff]  ;;  %v842_v1 = vld [vmem:[#allocation2 + $0x18] sm:$0xff]  ;;  %vm100_vm0 = vcmask 261120   ;;  %vm598_vm9 = vcmask 130048  }
   0xc   :  { %v837_v2 = vld [vmem:[#allocation2] sm:$0xff]  ;;  %v841_v3 = vld [vmem:[#allocation2 + $0x10] sm:$0xff]  ;;  %113 = vmatpush.bf16.msra.mxu0 %v838_v0  ;;  %325 = vmatpush.bf16.msra.mxu3 %v842_v1  ;;  %v836_v5 = vld [vmem:[%s1200_s0 + $0x8] sm:$0xff] }
   0xd   :  { %v835_v4 = vld [vmem:[%s1200_s0] sm:$0xff]  ;;  %v1073_v49 = vld [vmem:[%s1201_s1 + $0x8] sm:$0xff]  ;;  %v1087_v60 = vld [vmem:[%s1201_s1 + $0x10] sm:$0xff] }
   0xe   :  { %v849_v6 = vld [vmem:[#allocation4] ss:$0 sm:$0xff]  ;;  %v850_v10 = vld [vmem:[#allocation4 + $0x1] ss:$0 sm:$0xff] }
   0xf   :  { %v126_v36 = vld [vmem:[%s1203_s3] sm:$0x1]  ;;  %v338_v37 = vld [vmem:[%s1203_s3 + $0x1] sm:$0x1] }
  0x10   :  { %114 = vmatpush.bf16.msra.mxu0 %v837_v2  ;;  %326 = vmatpush.bf16.msra.mxu3 %v841_v3  ;;  %v1078_v50 = vld [vmem:[%s1201_s1] sm:$0xff] }
  0x13   :  { %770 = vmatmul.msk.bf16.vlgmr.msra.gmra.mxu0 %vm100_vm0, %v835_v4  ;;  %791 = vmatmul.msk.bf16.vlgmr.msra.gmra.mxu3 %vm100_vm0, %v835_v4 }
  0x23   :  { %771 = vmatmul.msk.bf16.gmra.mxu0 %vm100_vm0, %v836_v5  ;;  %792 = vmatmul.msk.bf16.gmra.mxu3 %vm100_vm0, %v836_v5 }
  0x90   :  { %v116_v7 = vpop.f32.mrf.mxu0 }
  0x91   :  { %v129_v8 = vmul.f32 %v849_v6, %v116_v7 }
  0x93   :  { %v133_v9 = vsel %vm100_vm0, %v129_v8, 0.0 }
  0x94   :  { %134 = vadd.xlane.f32.xlu0 %v133_v9 }
  0x96   :  { %v328_v11 = vpop.f32.mrf.mxu3 }
  0x97   :  { %v341_v12 = vmul.f32 %v850_v10, %v328_v11 }
  0x98   :  { %v118_v13 = vpop.f32.mrf.mxu0 }
  0x99   :  { %v345_v14 = vsel %vm100_vm0, %v341_v12, 0.0  ;;  %v130_v15 = vmul.f32 %v849_v6, %v118_v13  ;;  %v235_v30 = vpack.c.bf16 %v118_v13, %v116_v7 }
  0x9a   :  { %346 = vadd.xlane.f32.xlu1 %v345_v14 }
  0x9b   :  { %v136_v16 = vsel %vm100_vm0, %v130_v15, 0.0 }
  0x9c   :  { %137 = vadd.xlane.f32.xlu0 %v136_v16 }
  0x9e   :  { %v330_v17 = vpop.f32.mrf.mxu3 }
  0x9f   :  { %v342_v18 = vmul.f32 %v850_v10, %v330_v17  ;;  %v447_v35 = vpack.c.bf16 %v330_v17, %v328_v11 }
  0xa0   :  { %v121_v19 = vpop.f32.mrf.mxu0 }
  0xa1   :  { %v348_v20 = vsel %vm100_vm0, %v342_v18, 0.0  ;;  %v131_v21 = vmul.f32 %v849_v6, %v121_v19 }
  0xa2   :  { %349 = vadd.xlane.f32.xlu1 %v348_v20 }
  0xa3   :  { %v139_v22 = vsel %vm100_vm0, %v131_v21, 0.0 }
  0xa4   :  { %140 = vadd.xlane.f32.xlu2 %v139_v22 }
  0xa6   :  { %v333_v23 = vpop.f32.mrf.mxu3 }
  0xa7   :  { %v343_v24 = vmul.f32 %v850_v10, %v333_v23 }
  0xa8   :  { %v123_v25 = vpop.f32.mrf.mxu0 }
  0xa9   :  { %772 = vmatpush.xpose.msk.msra.mxu1 %vm100_vm0, %v123_v25  ;;  %v236_v26 = vpack.c.bf16 %v123_v25, %v121_v19  ;;  %v132_v27 = vmul.f32 %v849_v6, %v123_v25  ;;  %v351_v28 = vsel %vm100_vm0, %v343_v24, 0.0 }
  0xaa   :  { %352 = vadd.xlane.f32.xlu0 %v351_v28 }
  0xab   :  { %249 = vmatpush.bf16.msra.mxu2 %v236_v26  ;;  %v142_v29 = vsel %vm100_vm0, %v132_v27, 0.0 }
  0xac   :  { %143 = vadd.xlane.f32.xlu2 %v142_v29 }
  0xad   :  { %773 = vmatpush.xpose.msk.msra.mxu1 %vm100_vm0, %v121_v19  ;;  %v1096_v19 = vld [vmem:[%s1201_s1 + $0x18] sm:$0xff] }
  0xae   :  { %v335_v31 = vpop.f32.mrf.mxu3 }
  0xaf   :  { %250 = vmatpush.bf16.msra.mxu2 %v235_v30  ;;  %v448_v32 = vpack.c.bf16 %v335_v31, %v333_v23  ;;  %v344_v33 = vmul.f32 %v850_v10, %v335_v31 }
  0xb1   :  { %461 = vmatpush.bf16.msrb.mxu0 %v448_v32  ;;  %774 = vmatpush.xpose.msk.msra.mxu1 %vm100_vm0, %v118_v13  ;;  %v354_v34 = vsel %vm100_vm0, %v344_v33, 0.0 }
  0xb2   :  { %355 = vadd.xlane.f32.xlu1 %v354_v34 }
  0xb5   :  { %775 = vmatpush.xpose.msk.msra.mxu1 %vm100_vm0, %v116_v7  ;;  %462 = vmatpush.bf16.msrb.mxu0 %v447_v35 }
  0xb8   :  { %776 = vmatmul.msk.f32.vlgmr.msra.gmra.mxu1 %vm100_vm0, %v126_v36 }
  0xb9   :  { %793 = vmatpush.xpose.msk.msrb.mxu1 %vm100_vm0, %v335_v31 }
  0xbd   :  { %794 = vmatpush.xpose.msk.msrb.mxu1 %vm100_vm0, %v333_v23 }
  0xc1   :  { %795 = vmatpush.xpose.msk.msrb.mxu1 %vm100_vm0, %v330_v17 }
  0xc5   :  { %796 = vmatpush.xpose.msk.msrb.mxu1 %vm100_vm0, %v328_v11 }
  0xc8   :  { %797 = vmatmul.msk.f32.vlgmr.msrb.gmra.mxu1 %vm100_vm0, %v338_v37 }
 0x107   :  { %v135_v38 = vpop.xlane.xlu0 %134 }
 0x10d   :  { %v347_v39 = vpop.xlane.xlu1 %346 }
 0x10f   :  { %v138_v42 = vpop.xlane.xlu0 %137 }
 0x115   :  { %v350_v51 = vpop.xlane.xlu1 %349 }
 0x117   :  { %v141_v43 = vpop.xlane.xlu2 %140 }
 0x11d   :  { %v353_v0 = vpop.xlane.xlu0 %352 }
 0x11f   :  { %v144_v62 = vpop.xlane.xlu2 %143 }
 0x125   :  { %v356_v1 = vpop.xlane.xlu1 %355 }
 0x135   :  { %v177_v40 = vpop.f32.mrf.mxu1 }
 0x136   :  { %v180_v41 = vperm.slane %v177_v40, 0 }
 0x138   :  { %v182_v44 = vadd.f32 %v180_v41, %v138_v42  ;;  %v181_v45 = vadd.f32 %v180_v41, %v135_v38  ;;  %v183_v46 = vadd.f32 %v180_v41, %v141_v43  ;;  %v184_v3 = vadd.f32 %v180_v41, %v144_v62 }
 0x13a   :  { %v186_v47 = vmul.f32 0.2, %v182_v44  ;;  %v185_v48 = vmul.f32 0.2, %v181_v45  ;;  %v187_v54 = vmul.f32 0.2, %v183_v46 }
 0x13b   :  { %v188_v12 = vmul.f32 0.2, %v184_v3 }
 0x13c   :  { %v190_v52 = vmax.f32 %v182_v44, %v186_v47  ;;  %v189_v53 = vmax.f32 %v181_v45, %v185_v48  ;;  %v191_v59 = vmax.f32 %v183_v46, %v187_v54 }
 0x13d   :  { %v192_v24 = vmax.f32 %v184_v3, %v188_v12 }
 0x13e   :  { %v194_v55 = vadd.f32 %v190_v52, %v1073_v49  ;;  %v193_v56 = vadd.f32 %v189_v53, %v1078_v50  ;;  %v195_v2 = vadd.f32 %v191_v59, %v1087_v60 }
 0x13f   :  { %v196_v27 = vadd.f32 %v192_v24, %v1096_v19 }
 0x140   :  { %v200_v57 = vsel %vm100_vm0, %v194_v55, -inf  ;;  %v197_v58 = vsel %vm100_vm0, %v193_v56, -inf  ;;  %v203_v11 = vsel %vm100_vm0, %v195_v2, -inf }
 0x141   :  { %201 = vmax.xlane.f32.xlu0 %v200_v57  ;;  %198 = vmax.xlane.f32.xlu2 %v197_v58  ;;  %v206_v29 = vsel %vm100_vm0, %v196_v27, -inf }
 0x145   :  { %v389_v61 = vpop.f32.mrf.mxu1 }
 0x146   :  { %v392_v63 = vperm.slane %v389_v61, 0 }
 0x148   :  { %v393_v4 = vadd.f32 %v392_v63, %v347_v39  ;;  %v394_v5 = vadd.f32 %v392_v63, %v350_v51  ;;  %v396_v6 = vadd.f32 %v392_v63, %v356_v1  ;;  %v395_v7 = vadd.f32 %v392_v63, %v353_v0 }
 0x149   :  { %204 = vmax.xlane.f32.xlu0 %v203_v11 }
 0x14a   :  { %v397_v8 = vmul.f32 0.2, %v393_v4  ;;  %v398_v9 = vmul.f32 0.2, %v394_v5  ;;  %v400_v10 = vmul.f32 0.2, %v396_v6 }
 0x14b   :  { %v399_v16 = vmul.f32 0.2, %v395_v7 }
 0x14c   :  { %v401_v13 = vmax.f32 %v393_v4, %v397_v8  ;;  %v402_v14 = vmax.f32 %v394_v5, %v398_v9  ;;  %v404_v15 = vmax.f32 %v396_v6, %v400_v10 }
 0x14d   :  { %v403_v23 = vmax.f32 %v395_v7, %v399_v16  ;;  %v844_v16 = vld [vmem:[%s1206_s6 + $0x18] sm:$0xff] }
 0x14e   :  { %v405_v17 = vadd.f32 %v401_v13, %v1078_v50  ;;  %v406_v18 = vadd.f32 %v402_v14, %v1073_v49  ;;  %v408_v20 = vadd.f32 %v404_v15, %v1096_v19  ;;  %v840_v13 = vld [vmem:[%s1206_s6 + $0x8] sm:$0xff]  ;;  %v839_v14 = vld [vmem:[%s1206_s6] sm:$0xff]  ;;  %539 = vmatpush.bf16.msra.mxu1 %v844_v16 }
 0x14f   :  { %v407_v26 = vadd.f32 %v403_v23, %v1087_v60  ;;  %576 = vmatpush.bf16.msrb.mxu2 %v840_v13 }
 0x150   :  { %v409_v21 = vsel %vm100_vm0, %v405_v17, -inf  ;;  %v412_v22 = vsel %vm100_vm0, %v406_v18, -inf  ;;  %v418_v25 = vsel %vm100_vm0, %v408_v20, -inf }
 0x151   :  { %410 = vmax.xlane.f32.xlu1 %v409_v21  ;;  %413 = vmax.xlane.f32.xlu2 %v412_v22  ;;  %v415_v28 = vsel %vm100_vm0, %v407_v26, -inf  ;;  %v1133_v21 = vld [vmem:[%s1205_s5] ss:$0 sm:$0xff] }
 0x152   :  { %419 = vmax.xlane.f32.xlu0 %v418_v25 }
 0x153   :  { %577 = vmatpush.bf16.msrb.mxu2 %v839_v14 }
 0x159   :  { %416 = vmax.xlane.f32.xlu2 %v415_v28  ;;  %207 = vmax.xlane.f32.xlu1 %v206_v29 }
 0x1b4   :  { %v202_v30 = vpop.xlane.xlu0 %201  ;;  %v199_v31 = vpop.xlane.xlu2 %198 }
 0x1b5   :  { %v210_v32 = vsub.f32 %v194_v55, %v202_v30  ;;  %v209_v33 = vsub.f32 %v193_v56, %v199_v31 }
 0x1b7   :  { %v215_v34 = vmul.f32 1.442695, %v210_v32  ;;  %v213_v35 = vmul.f32 1.442695, %v209_v33 }
 0x1b9   :  { %855 = vpow2.f32 %v215_v34 }
 0x1ba   :  { %857 = vpow2.f32 %v213_v35 }
 0x1bc   :  { %v205_v36 = vpop.xlane.xlu0 %204 }
 0x1bd   :  { %v211_v37 = vsub.f32 %v195_v2, %v205_v36 }
 0x1bf   :  { %v856_v38 = vpop.eup %855  ;;  %v217_v39 = vmul.f32 1.442695, %v211_v37 }
 0x1c0   :  { %v858_v40 = vpop.eup %857  ;;  %v224_v41 = vsel %vm100_vm0, %v856_v38, 0.0 }
 0x1c1   :  { %859 = vpow2.f32 %v217_v39  ;;  %225 = vadd.xlane.f32.xlu2 %v224_v41  ;;  %v221_v43 = vsel %vm100_vm0, %v858_v40, 0.0  ;;  %v233_v45 = vpack.c.bf16 %v856_v38, %v858_v40 }
 0x1c2   :  { %222 = vadd.xlane.f32.xlu1 %v221_v43 }
 0x1c3   :  { %777 = vmatmul.msk.bf16.vlgmr.msra.gmra.mxu2 %vm100_vm0, %v233_v45 }
 0x1c4   :  { %v411_v42 = vpop.xlane.xlu1 %410  ;;  %v414_v44 = vpop.xlane.xlu2 %413 }
 0x1c5   :  { %v421_v46 = vsub.f32 %v405_v17, %v411_v42  ;;  %v422_v47 = vsub.f32 %v406_v18, %v414_v44  ;;  %v420_v52 = vpop.xlane.xlu0 %419  ;;  %v843_v17 = vld [vmem:[%s1206_s6 + $0x10] sm:$0xff] }
 0x1c6   :  { %v424_v53 = vsub.f32 %v408_v20, %v420_v52  ;;  %540 = vmatpush.bf16.msra.mxu1 %v843_v17 }
 0x1c7   :  { %v425_v48 = vmul.f32 1.442695, %v421_v46  ;;  %v427_v51 = vmul.f32 1.442695, %v422_v47  ;;  %v860_v54 = vpop.eup %859 }
 0x1c8   :  { %v431_v55 = vmul.f32 1.442695, %v424_v53  ;;  %v227_v56 = vsel %vm100_vm0, %v860_v54, 0.0 }
 0x1c9   :  { %861 = vpow2.f32 %v425_v48  ;;  %228 = vadd.xlane.f32.xlu2 %v227_v56 }
 0x1ca   :  { %863 = vpow2.f32 %v427_v51 }
 0x1cb   :  { %865 = vpow2.f32 %v431_v55 }
 0x1cc   :  { %v208_v57 = vpop.xlane.xlu1 %207  ;;  %v417_v58 = vpop.xlane.xlu2 %416 }
 0x1cd   :  { %v212_v59 = vsub.f32 %v196_v27, %v208_v57  ;;  %v423_v61 = vsub.f32 %v407_v26, %v417_v58  ;;  %v1139_v27 = vld [vmem:[%s1205_s5 + $0x1] ss:$0 sm:$0xff] }
 0x1cf   :  { %v862_v62 = vpop.eup %861  ;;  %v219_v63 = vmul.f32 1.442695, %v212_v59  ;;  %v429_v0 = vmul.f32 1.442695, %v423_v61 }
 0x1d0   :  { %v864_v1 = vpop.eup %863  ;;  %v433_v2 = vsel %vm100_vm0, %v862_v62, 0.0 }
 0x1d1   :  { %867 = vpow2.f32 %v219_v63  ;;  %434 = vadd.xlane.f32.xlu0 %v433_v2  ;;  %v436_v3 = vsel %vm100_vm0, %v864_v1, 0.0  ;;  %v445_v4 = vpack.c.bf16 %v864_v1, %v862_v62  ;;  %v866_v5 = vpop.eup %865 }
 0x1d2   :  { %869 = vpow2.f32 %v429_v0  ;;  %437 = vadd.xlane.f32.xlu1 %v436_v3  ;;  %v442_v6 = vsel %vm100_vm0, %v866_v5, 0.0 }
 0x1d3   :  { %798 = vmatmul.msk.bf16.vlgmr.msrb.gmra.mxu0 %vm100_vm0, %v445_v4  ;;  %443 = vadd.xlane.f32.xlu2 %v442_v6 }
 0x1d7   :  { %v868_v7 = vpop.eup %867 }
 0x1d8   :  { %v870_v8 = vpop.eup %869  ;;  %v230_v9 = vsel %vm100_vm0, %v868_v7, 0.0  ;;  %v234_v10 = vpack.c.bf16 %v868_v7, %v860_v54 }
 0x1d9   :  { %231 = vadd.xlane.f32.xlu0 %v230_v9  ;;  %v439_v11 = vsel %vm100_vm0, %v870_v8, 0.0  ;;  %v446_v12 = vpack.c.bf16 %v866_v5, %v870_v8 }
 0x1da   :  { %440 = vadd.xlane.f32.xlu1 %v439_v11  ;;  %778 = vmatmul.msk.bf16.gmra.mxu2 %vm100_vm0, %v234_v10 }
 0x1e3   :  { %799 = vmatmul.msk.bf16.gmra.mxu0 %vm100_vm0, %v446_v12 }
 0x234   :  { %v226_v20 = vpop.xlane.xlu2 %225 }
 0x235   :  { %v223_v15 = vpop.xlane.xlu1 %222 }
 0x236   :  { %871 = vrcp.f32 %v223_v15 }
 0x23c   :  { %v872_v22 = vpop.eup %871  ;;  %v229_v36 = vpop.xlane.xlu2 %228 }
 0x244   :  { %v435_v18 = vpop.xlane.xlu0 %434 }
 0x245   :  { %873 = vrcp.f32 %v435_v18  ;;  %v438_v26 = vpop.xlane.xlu1 %437 }
 0x246   :  { %v252_v23 = vpop.f32.mrf.mxu2  ;;  %875 = vrcp.f32 %v226_v20  ;;  %v444_v55 = vpop.xlane.xlu2 %443 }
 0x247   :  { %v266_v24 = vmul.f32 %v872_v22, %v252_v23  ;;  %877 = vrcp.f32 %v438_v26 }
 0x249   :  { %v272_v25 = vadd.f32 %v1133_v21, %v266_v24 }
 0x24b   :  { %v874_v28 = vpop.eup %873  ;;  %v280_v29 = vmul.f32 1.442695, %v272_v25  ;;  %vm276_vm1 = vcmp.gt.f32.partialorder %v272_v25, 0.0 }
 0x24c   :  { %v876_v31 = vpop.eup %875  ;;  %v232_v45 = vpop.xlane.xlu0 %231 }
 0x24d   :  { %879 = vpow2.f32 %v280_v29  ;;  %v441_v39 = vpop.xlane.xlu1 %440  ;;  %v878_v41 = vpop.eup %877 }
 0x24e   :  { %v254_v33 = vpop.f32.mrf.mxu2  ;;  %881 = vrcp.f32 %v229_v36 }
 0x24f   :  { %v267_v34 = vmul.f32 %v876_v31, %v254_v33 }
 0x250   :  { %v464_v30 = vpop.f32.mrf.mxu0 }
 0x251   :  { %v478_v32 = vmul.f32 %v874_v28, %v464_v30  ;;  %v273_v37 = vadd.f32 %v1133_v21, %v267_v34 }
 0x253   :  { %v484_v35 = vadd.f32 %v1139_v27, %v478_v32  ;;  %v282_v38 = vmul.f32 1.442695, %v273_v37  ;;  %v880_v44 = vpop.eup %879  ;;  %vm277_vm2 = vcmp.gt.f32.partialorder %v273_v37, 0.0 }
 0x254   :  { %v882_v47 = vpop.eup %881  ;;  %v779_v48 = vadd.f32 -1.0, %v880_v44 }
 0x255   :  { %v492_v40 = vmul.f32 1.442695, %v484_v35  ;;  %883 = vpow2.f32 %v282_v38  ;;  %vm488_vm3 = vcmp.gt.f32.partialorder %v484_v35, 0.0 }
 0x256   :  { %885 = vrcp.f32 %v441_v39  ;;  %v292_v62 = vsel %vm276_vm1, %v272_v25, %v779_v48 }
 0x257   :  { %887 = vpow2.f32 %v492_v40 }
 0x258   :  { %v466_v42 = vpop.f32.mrf.mxu0  ;;  %889 = vrcp.f32 %v232_v45 }
 0x259   :  { %v479_v43 = vmul.f32 %v878_v41, %v466_v42 }
 0x25b   :  { %v485_v46 = vadd.f32 %v1139_v27, %v479_v43  ;;  %v884_v53 = vpop.eup %883 }
 0x25c   :  { %v780_v56 = vadd.f32 -1.0, %v884_v53  ;;  %v886_v57 = vpop.eup %885 }
 0x25d   :  { %v494_v51 = vmul.f32 1.442695, %v485_v46  ;;  %v257_v52 = vpop.f32.mrf.mxu2  ;;  %v888_v61 = vpop.eup %887  ;;  %vm489_vm4 = vcmp.gt.f32.partialorder %v485_v46, 0.0 }
 0x25e   :  { %v268_v54 = vmul.f32 %v882_v47, %v257_v52  ;;  %v293_v63 = vsel %vm277_vm2, %v273_v37, %v780_v56  ;;  %v890_v3 = vpop.eup %889  ;;  %v800_v4 = vadd.f32 -1.0, %v888_v61  ;;  %v853_v37 = vld [vmem:[%s1208_s8] ss:$0 sm:$0xff] }
 0x25f   :  { %891 = vpow2.f32 %v494_v51  ;;  %v296_v1 = vpack.c.bf16 %v293_v63, %v292_v62  ;;  %v589_v61 = vld [vmem:[%s1207_s7] sm:$0x1] }
 0x260   :  { %v274_v58 = vadd.f32 %v1133_v21, %v268_v54  ;;  %v469_v59 = vpop.f32.mrf.mxu0  ;;  %893 = vrcp.f32 %v444_v55  ;;  %v504_v12 = vsel %vm488_vm3, %v484_v35, %v800_v4 }
 0x261   :  { %v480_v0 = vmul.f32 %v886_v57, %v469_v59  ;;  %826 = vmatmul.msk.bf16.vlgmr.msrb.gmra.mxu2 %vm100_vm0, %v296_v1 }
 0x262   :  { %v284_v5 = vmul.f32 1.442695, %v274_v58  ;;  %vm278_vm5 = vcmp.gt.f32.partialorder %v274_v58, 0.0 }
 0x263   :  { %v486_v2 = vadd.f32 %v1139_v27, %v480_v0 }
 0x264   :  { %895 = vpow2.f32 %v284_v5 }
 0x265   :  { %v892_v6 = vpop.eup %891  ;;  %v259_v7 = vpop.f32.mrf.mxu2  ;;  %v496_v10 = vmul.f32 1.442695, %v486_v2  ;;  %vm490_vm7 = vcmp.gt.f32.partialorder %v486_v2, 0.0 }
 0x266   :  { %v801_v8 = vadd.f32 -1.0, %v892_v6  ;;  %v269_v9 = vmul.f32 %v890_v3, %v259_v7  ;;  %v894_v11 = vpop.eup %893 }
 0x267   :  { %897 = vpow2.f32 %v496_v10 }
 0x268   :  { %v505_v13 = vsel %vm489_vm4, %v485_v46, %v801_v8  ;;  %v275_v14 = vadd.f32 %v1133_v21, %v269_v9  ;;  %v471_v15 = vpop.f32.mrf.mxu0 }
 0x269   :  { %v508_v16 = vpack.c.bf16 %v505_v13, %v504_v12  ;;  %v481_v17 = vmul.f32 %v894_v11, %v471_v15 }
 0x26a   :  { %v286_v18 = vmul.f32 1.442695, %v275_v14  ;;  %v896_v23 = vpop.eup %895  ;;  %vm279_vm6 = vcmp.gt.f32.partialorder %v275_v14, 0.0 }
 0x26b   :  { %v487_v20 = vadd.f32 %v1139_v27, %v481_v17  ;;  %816 = vmatmul.msk.bf16.vlgmr.msra.gmra.mxu1 %vm100_vm0, %v508_v16  ;;  %v781_v25 = vadd.f32 -1.0, %v896_v23 }
 0x26c   :  { %899 = vpow2.f32 %v286_v18 }
 0x26d   :  { %v498_v22 = vmul.f32 1.442695, %v487_v20  ;;  %v898_v24 = vpop.eup %897  ;;  %v294_v30 = vsel %vm278_vm5, %v274_v58, %v781_v25  ;;  %vm491_vm8 = vcmp.gt.f32.partialorder %v487_v20, 0.0 }
 0x26e   :  { %v802_v29 = vadd.f32 -1.0, %v898_v24 }
 0x26f   :  { %901 = vpow2.f32 %v498_v22 }
 0x270   :  { %v506_v27 = vsel %vm490_vm7, %v486_v2, %v802_v29 }
 0x272   :  { %v900_v26 = vpop.eup %899 }
 0x273   :  { %v782_v28 = vadd.f32 -1.0, %v900_v26 }
 0x275   :  { %v902_v21 = vpop.eup %901  ;;  %v295_v31 = vsel %vm279_vm6, %v275_v14, %v782_v28 }
 0x276   :  { %v803_v32 = vadd.f32 -1.0, %v902_v21  ;;  %v297_v33 = vpack.c.bf16 %v295_v31, %v294_v30 }
 0x278   :  { %827 = vmatmul.msk.bf16.gmra.mxu2 %vm100_vm0, %v297_v33  ;;  %v507_v34 = vsel %vm491_vm8, %v487_v20, %v803_v32 }
 0x279   :  { %v509_v35 = vpack.c.bf16 %v507_v34, %v506_v27 }
 0x27b   :  { %817 = vmatmul.msk.bf16.gmra.mxu1 %vm100_vm0, %v509_v35 }
 0x2e4   :  { %v579_v36 = vpop.f32.mrf.mxu2 }
 0x2e8   :  { %v542_v38 = vpop.f32.mrf.mxu1 }
 0x2e9   :  { %v580_v39 = vadd.f32 %v579_v36, %v542_v38 }
 0x2eb   :  { %v594_v40 = vmul.f32 %v853_v37, %v580_v39 }
 0x2ec   :  { %v581_v42 = vpop.f32.mrf.mxu2 }
 0x2ed   :  { %v599_v41 = vsel %vm598_vm9, %v594_v40, 0.0 }
 0x2ee   :  { %600 = vadd.xlane.f32.xlu0 %v599_v41 }
 0x2f0   :  { %v544_v43 = vpop.f32.mrf.mxu1 }
 0x2f1   :  { %v582_v44 = vadd.f32 %v581_v42, %v544_v43 }
 0x2f3   :  { %v595_v45 = vmul.f32 %v853_v37, %v582_v44  ;;  %v701_v62 = vpack.c.bf16 %v582_v44, %v580_v39 }
 0x2f5   :  { %v602_v46 = vsel %vm598_vm9, %v595_v45, 0.0 }
 0x2f6   :  { %603 = vadd.xlane.f32.xlu1 %v602_v46  ;;  %v854_v46 = vld [vmem:[%s1209_s9] ss:$0 sm:$0xff] }
 0x2f8   :  { %v547_v47 = vpop.f32.mrf.mxu1 }
 0x2fb   :  { %v584_v48 = vpop.f32.mrf.mxu2 }
 0x2fc   :  { %v585_v51 = vadd.f32 %v584_v48, %v547_v47 }
 0x2fe   :  { %v596_v52 = vmul.f32 %v853_v37, %v585_v51 }
 0x300   :  { %v605_v53 = vsel %vm598_vm9, %v596_v52, 0.0  ;;  %v549_v54 = vpop.f32.mrf.mxu1 }
 0x301   :  { %606 = vadd.xlane.f32.xlu2 %v605_v53 }
 0x303   :  { %v586_v55 = vpop.f32.mrf.mxu2 }
 0x304   :  { %v587_v56 = vadd.f32 %v586_v55, %v549_v54 }
 0x306   :  { %828 = vmatpush.xpose.msk.msrb.mxu3 %vm598_vm9, %v587_v56  ;;  %v597_v57 = vmul.f32 %v853_v37, %v587_v56  ;;  %v702_v59 = vpack.c.bf16 %v587_v56, %v585_v51 }
 0x308   :  { %v608_v58 = vsel %vm598_vm9, %v597_v57, 0.0 }
 0x309   :  { %609 = vadd.xlane.f32.xlu0 %v608_v58 }
 0x30a   :  { %829 = vmatpush.xpose.msk.msrb.mxu3 %vm598_vm9, %v585_v51 }
 0x30e   :  { %830 = vmatpush.xpose.msk.msrb.mxu3 %vm598_vm9, %v582_v44 }
 0x312   :  { %831 = vmatpush.xpose.msk.msrb.mxu3 %vm598_vm9, %v580_v39 }
 0x315   :  { %832 = vmatmul.msk.f32.vlgmr.msrb.gmra.mxu3 %vm598_vm9, %v589_v61 }
 0x316   :  { %715 = vmatpush.bf16.msra.mxu3 %v702_v59 }
 0x31a   :  { %716 = vmatpush.bf16.msra.mxu3 %v701_v62 }
 0x361   :  { %v601_v63 = vpop.xlane.xlu0 %600 }
 0x369   :  { %v604_v1 = vpop.xlane.xlu1 %603 }
 0x374   :  { %v607_v3 = vpop.xlane.xlu2 %606 }
 0x37c   :  { %v610_v4 = vpop.xlane.xlu0 %609 }
 0x398   :  { %v643_v0 = vpop.f32.mrf.mxu3 }
 0x399   :  { %v646_v2 = vperm.slane %v643_v0, 0 }
 0x39b   :  { %v648_v5 = vadd.f32 %v646_v2, %v604_v1  ;;  %v647_v6 = vadd.f32 %v646_v2, %v601_v63  ;;  %v649_v7 = vadd.f32 %v646_v2, %v607_v3  ;;  %v650_v8 = vadd.f32 %v646_v2, %v610_v4 }
 0x39d   :  { %v652_v9 = vmul.f32 0.2, %v648_v5  ;;  %v651_v10 = vmul.f32 0.2, %v647_v6  ;;  %v653_v11 = vmul.f32 0.2, %v649_v7 }
 0x39e   :  { %v654_v15 = vmul.f32 0.2, %v650_v8 }
 0x39f   :  { %v656_v12 = vmax.f32 %v648_v5, %v652_v9  ;;  %v655_v13 = vmax.f32 %v647_v6, %v651_v10  ;;  %v657_v14 = vmax.f32 %v649_v7, %v653_v11 }
 0x3a0   :  { %v658_v24 = vmax.f32 %v650_v8, %v654_v15 }
 0x3a1   :  { %v660_v16 = vadd.f32 %v656_v12, %v1073_v49  ;;  %v659_v17 = vadd.f32 %v655_v13, %v1078_v50  ;;  %v661_v18 = vadd.f32 %v657_v14, %v1087_v60 }
 0x3a2   :  { %v662_v25 = vadd.f32 %v658_v24, %v1096_v19 }
 0x3a3   :  { %v666_v20 = vsel %vm100_vm0, %v660_v16, -inf  ;;  %v663_v22 = vsel %vm100_vm0, %v659_v17, -inf  ;;  %v669_v23 = vsel %vm100_vm0, %v661_v18, -inf }
 0x3a4   :  { %667 = vmax.xlane.f32.xlu2 %v666_v20  ;;  %664 = vmax.xlane.f32.xlu1 %v663_v22  ;;  %v672_v26 = vsel %vm100_vm0, %v662_v25, -inf }
 0x3a5   :  { %670 = vmax.xlane.f32.xlu0 %v669_v23 }
 0x3ac   :  { %673 = vmax.xlane.f32.xlu1 %v672_v26 }
 0x417   :  { %v668_v49 = vpop.xlane.xlu2 %667  ;;  %v665_v28 = vpop.xlane.xlu1 %664 }
 0x418   :  { %v676_v50 = vsub.f32 %v660_v16, %v668_v49  ;;  %v675_v29 = vsub.f32 %v659_v17, %v665_v28  ;;  %v671_v60 = vpop.xlane.xlu0 %670 }
 0x419   :  { %v677_v21 = vsub.f32 %v661_v18, %v671_v60 }
 0x41a   :  { %v681_v30 = vmul.f32 1.442695, %v676_v50  ;;  %v679_v31 = vmul.f32 1.442695, %v675_v29 }
 0x41b   :  { %v683_v32 = vmul.f32 1.442695, %v677_v21 }
 0x41c   :  { %903 = vpow2.f32 %v681_v30 }
 0x41d   :  { %905 = vpow2.f32 %v679_v31 }
 0x41e   :  { %907 = vpow2.f32 %v683_v32 }
 0x41f   :  { %v674_v33 = vpop.xlane.xlu1 %673 }
 0x420   :  { %v678_v27 = vsub.f32 %v662_v25, %v674_v33 }
 0x422   :  { %v904_v34 = vpop.eup %903  ;;  %v685_v35 = vmul.f32 1.442695, %v678_v27 }
 0x423   :  { %v906_v19 = vpop.eup %905  ;;  %v690_v36 = vsel %vm100_vm0, %v904_v34, 0.0 }
 0x424   :  { %v908_v37 = vpop.eup %907  ;;  %v699_v38 = vpack.c.bf16 %v904_v34, %v906_v19  ;;  %909 = vpow2.f32 %v685_v35  ;;  %v687_v39 = vsel %vm100_vm0, %v906_v19, 0.0  ;;  %691 = vadd.xlane.f32.xlu0 %v690_v36 }
 0x425   :  { %688 = vadd.xlane.f32.xlu2 %v687_v39  ;;  %v693_v40 = vsel %vm100_vm0, %v908_v37, 0.0 }
 0x426   :  { %694 = vadd.xlane.f32.xlu1 %v693_v40  ;;  %833 = vmatmul.msk.bf16.vlgmr.msra.gmra.mxu3 %vm100_vm0, %v699_v38 }
 0x42a   :  { %v910_v41 = vpop.eup %909 }
 0x42b   :  { %v696_v42 = vsel %vm100_vm0, %v910_v41, 0.0  ;;  %v700_v43 = vpack.c.bf16 %v910_v41, %v908_v37 }
 0x42d   :  { %697 = vadd.xlane.f32.xlu2 %v696_v42 }
 0x436   :  { %834 = vmatmul.msk.bf16.gmra.mxu3 %vm100_vm0, %v700_v43 }
 0x497   :  { %v692_v45 = vpop.xlane.xlu0 %691 }
 0x498   :  { %v689_v44 = vpop.xlane.xlu2 %688 }
 0x499   :  { %911 = vrcp.f32 %v689_v44  ;;  %v695_v53 = vpop.xlane.xlu1 %694 }
 0x49a   :  { %913 = vrcp.f32 %v692_v45 }
 0x49b   :  { %915 = vrcp.f32 %v695_v53 }
 0x49f   :  { %v912_v47 = vpop.eup %911 }
 0x4a0   :  { %v914_v54 = vpop.eup %913  ;;  %v698_v58 = vpop.xlane.xlu2 %697 }
 0x4a1   :  { %v916_v59 = vpop.eup %915  ;;  %917 = vrcp.f32 %v698_v58 }
 0x4a7   :  { %v918_v0 = vpop.eup %917 }
 0x4a9   :  { %v718_v48 = vpop.f32.mrf.mxu3 }
 0x4aa   :  { %v732_v51 = vmul.f32 %v912_v47, %v718_v48 }
 0x4ac   :  { %v740_v52 = vadd.f32 %v854_v46, %v732_v51 }
 0x4ae   :  { %744 = vst.msk [vmem:[%s1210_s10] sm:$0xff] %vm598_vm9, %v740_v52 }
 0x4b1   :  { %v720_v55 = vpop.f32.mrf.mxu3 }
 0x4b2   :  { %v733_v56 = vmul.f32 %v914_v54, %v720_v55 }
 0x4b4   :  { %v741_v57 = vadd.f32 %v854_v46, %v733_v56 }
 0x4b6   :  { %745 = vst.msk [vmem:[%s1210_s10 + $0x8] sm:$0xff] %vm598_vm9, %v741_v57 }
 0x4b9   :  { %v723_v61 = vpop.f32.mrf.mxu3 }
 0x4ba   :  { %v734_v62 = vmul.f32 %v916_v59, %v723_v61 }
 0x4bc   :  { %v742_v63 = vadd.f32 %v854_v46, %v734_v62 }
 0x4be   :  { %746 = vst.msk [vmem:[%s1210_s10 + $0x10] sm:$0xff] %vm598_vm9, %v742_v63 }
 0x4c1   :  { %v725_v1 = vpop.f32.mrf.mxu3 }
 0x4c2   :  { %v735_v2 = vmul.f32 %v918_v0, %v725_v1 }
 0x4c4   :  { %v743_v3 = vadd.f32 %v854_v46, %v735_v2 }
 0x4c6   :  { %747 = vst.msk [vmem:[%s1210_s10 + $0x18] sm:$0xff] %vm598_vm9, %v743_v3 }
 0x4c7   :  { %752 = vsyncpa [#allocation3], 1 }
 0x4c8   :  { %753 = vsyncpa [#allocation5], 1 }

</bundles_post_ra>
